<compile_context>
chip_gen: v7x
topology: tpu7x:2x2x1
jax: 0.10.0
libtpu: 0.0.40
codegen_flags: <defaults>
</compile_context>

<pallas_src>
import jax
import jax.numpy as jnp
from jax.experimental import pallas as pl
from jax.experimental.pallas import tpu as pltpu


def _round_up(x, m):
    return ((x + m - 1) // m) * m


def _make_resident_gather_kernel(num_rows, k_chunk, use_matmul, exact_f32):
    """Gather body with the table fully resident in VMEM.

    idx_ref:   (TB, 1)          int32 index tile (varies per grid step)
    table_ref: (N[_pad], D)     whole table, single un-pipelined VMEM copy
    out_ref:   (TB, D)          lane/sublane-dense output tile
    """
    dot_kwargs = {"preferred_element_type": jnp.float32}
    if exact_f32:
        # f32 x f32 MXU matmul defaults to bf16 passes; HIGHEST keeps the
        # one-hot gather bit-exact.
        dot_kwargs["precision"] = jax.lax.Precision.HIGHEST

    def kernel(idx_ref, table_ref, out_ref):
        tb, d = out_ref.shape
        # Clamp in-kernel (one VPU op per tile): keeps padded / ragged-tile
        # rows and bad user indices inside the VMEM-resident table.
        idx = jnp.clip(idx_ref[...], 0, num_rows - 1)              # (TB, 1)

        if use_matmul:
            if num_rows <= k_chunk:
                one_hot = (idx == jax.lax.broadcasted_iota(
                    jnp.int32, (tb, num_rows), 1)).astype(table_ref.dtype)
                acc = jnp.dot(one_hot, table_ref[...], **dot_kwargs)
            else:
                # Chunk the contraction over N: the live one-hot is capped at
                # (TB, K_CHUNK) instead of (TB, N), so very large tables don't
                # blow vregs / VMEM.
                n_chunks = pl.cdiv(num_rows, k_chunk)

                def body(c, acc):
                    k0 = pl.multiple_of(c * k_chunk, k_chunk)
                    tbl_c = table_ref[pl.ds(k0, k_chunk), :]
                    one_hot = ((idx - k0) == jax.lax.broadcasted_iota(
                        jnp.int32, (tb, k_chunk), 1)).astype(table_ref.dtype)
                    return acc + jnp.dot(one_hot, tbl_c, **dot_kwargs)

                acc = jax.lax.fori_loop(0, n_chunks, body,
                                        jnp.zeros((tb, d), jnp.float32))
            out_ref[...] = acc.astype(out_ref.dtype)
        else:
            # Compare+select on the VPU in the table's NATIVE dtype (no blanket
            # f32 upcast).  The accumulator starts as row 0 (clamped / padded
            # rows already map there) so there is no (TB, D) zero fill and one
            # fewer select.  The compare stays on the narrow (TB, 1) index and
            # only the select itself touches (TB, D) vregs.
            tbl = table_ref[...]                                    # (N, D)
            acc = jnp.broadcast_to(tbl[0:1, :], (tb, d))
            for row in range(1, num_rows):                          # static unroll
                acc = jnp.where(idx == row, tbl[row:row + 1, :], acc)
            out_ref[...] = acc.astype(out_ref.dtype)

    return kernel


def _make_streamed_gather_kernel(num_rows, tkn, exact_f32):
    """Gather body for tables streamed through VMEM in (TKN, D) blocks."""
    dot_kwargs = {"preferred_element_type": jnp.float32}
    if exact_f32:
        dot_kwargs["precision"] = jax.lax.Precision.HIGHEST

    def kernel(idx_ref, table_ref, out_ref, acc_ref):
        k = pl.program_id(1)
        tb, _ = out_ref.shape

        @pl.when(k == 0)
        def _():
            acc_ref[...] = jnp.zeros_like(acc_ref)

        idx = jnp.clip(idx_ref[...], 0, num_rows - 1)
        k0 = k * tkn
        one_hot = ((idx - k0) == jax.lax.broadcasted_iota(
            jnp.int32, (tb, tkn), 1)).astype(table_ref.dtype)
        acc_ref[...] += jnp.dot(one_hot, table_ref[...], **dot_kwargs)

        @pl.when(k == pl.num_programs(1) - 1)
        def _():
            out_ref[...] = acc_ref[...].astype(out_ref.dtype)

    return kernel


def group_embedding_lookup(table, indices, *, tile_rows=1024, k_chunk=512,
                           matmul_min_rows=128,
                           resident_table_budget=24 << 20):
    """Pallas equivalent of GroupEmbeddingLayer.forward: out = table[indices].

    tile_rows:        output rows per grid step (1024-2048 is good on v5e/v6e;
                      keep ~1024 on v7x with its 64 MiB VMEM per TensorCore).
    matmul_min_rows:  N at/above which f32 tables use the one-hot MXU gather.
                      128 fills v5e's 128-wide MXU contraction; set 256 on
                      v6e/v7x (256-wide MXU).  Sub-f32 float tables always use
                      the MXU (offloads the otherwise-saturated VALU).
    resident_table_budget: tables larger than this stream through VMEM over a
                      second grid axis instead of being held resident.
    """
    n, d = table.shape
    tdtype = jnp.dtype(table.dtype)
    out_itemsize = tdtype.itemsize
    table_is_float = jnp.issubdtype(tdtype, jnp.floating)
    exact_f32 = tdtype == jnp.dtype(jnp.float32)

    flat_idx = indices.reshape(-1).astype(jnp.int32)
    b = flat_idx.shape[0]
    # TODO(synk): nn.Embedding raises on out-of-range indices; they are clamped
    # in-kernel here instead (a bad index silently returns row 0 / row n-1).

    # Sublane multiple for dense (unmasked) output stores: 8 f32, 16 bf16, 32 int8.
    sub = max(8, 32 // out_itemsize)
    tb = _round_up(min(b, tile_rows), sub)
    num_blocks = pl.cdiv(b, tb)
    b_pad = num_blocks * tb

    # Pad only the (tiny) index array so every index tile is full; the output
    # keeps its natural (b, d) shape and Pallas masks the ragged last block.
    if b_pad == b:
        idx_padded = flat_idx[:, None]
    else:
        idx_padded = jnp.zeros((b_pad, 1), jnp.int32).at[:b, 0].set(flat_idx)

    table_bytes = n * d * out_itemsize
    cost = pl.CostEstimate(                 # memory-bound gather: ~0 real flops
        flops=0, transcendentals=0,
        bytes_accessed=b * d * out_itemsize + b * 4 + table_bytes)

    if table_bytes <= resident_table_budget:
        # ------------------------ resident-table path ------------------------
        if table_is_float:
            use_matmul = (not exact_f32) or n >= matmul_min_rows
        else:
            use_matmul = False     # v7x MXU has no int support -> VPU selects

        tbl = table
        if use_matmul and n > k_chunk and n % k_chunk != 0:
            # Pad table rows so every contraction chunk reads in-bounds VMEM
            # (padded rows are zeros; the in-kernel clamp never selects them).
            tbl = jnp.zeros((_round_up(n, k_chunk), d), tdtype).at[:n, :].set(table)

        kernel = _make_resident_gather_kernel(n, k_chunk, use_matmul, exact_f32)

        onehot_cols = min(n, k_chunk) if use_matmul else 0
        vmem_bytes = (tbl.shape[0] * d * out_itemsize   # table, single copy
                      + 2 * tb * d * out_itemsize       # double-buffered out tile
                      + 2 * tb * 4                      # double-buffered idx tile
                      + tb * max(onehot_cols, 8) * 4    # one-hot / select temps
                      + tb * d * 4)                     # f32 accumulator
        vmem_limit = min(max(int(vmem_bytes * 1.5) + (4 << 20), 16 << 20), 48 << 20)

        # Only split batch tiles across TensorCores when there are enough of
        # them and the table is cheap to duplicate per core (on v7x each TC
        # would re-DMA and hold its own resident-table copy).
        dims = ("parallel",) if (num_blocks >= 4 and table_bytes <= (4 << 20)) \
            else ("arbitrary",)

        out = pl.pallas_call(
            kernel,
            out_shape=jax.ShapeDtypeStruct((b, d), tdtype),
            grid_spec=pltpu.PrefetchScalarGridSpec(
                num_scalar_prefetch=0,
                grid=(num_blocks,),
                in_specs=[
                    pl.BlockSpec((tb, 1), lambda i: (i, 0)),
                    # Whole table as one un-pipelined VMEM copy: a single HBM
                    # DMA and no double buffer.
                    pl.BlockSpec(memory_space=pltpu.MemorySpace.VMEM),
                ],
                out_specs=pl.BlockSpec((tb, d), lambda i: (i, 0)),
            ),
            compiler_params=pltpu.CompilerParams(
                dimension_semantics=dims,
                vmem_limit_bytes=vmem_limit),
            cost_estimate=cost,
        )(idx_padded, tbl)
    else:
        # ----------- streamed-table path (very large tables / v7x) -----------
        tkn = k_chunk
        n_pad = _round_up(n, tkn)
        tbl = table
        if not table_is_float:
            # TODO(synk): integer tables on the streamed path are gathered via
            # an f32 one-hot contraction (exact only for |values| < 2**24).
            tbl = tbl.astype(jnp.float32)
        if n_pad != n:
            tbl = jnp.zeros((n_pad, d), tbl.dtype).at[:n, :].set(tbl)
        exact = tbl.dtype == jnp.dtype(jnp.float32)

        kernel = _make_streamed_gather_kernel(n, tkn, exact)

        vmem_bytes = (2 * tkn * d * tbl.dtype.itemsize   # streamed table blocks
                      + 2 * tb * d * out_itemsize
                      + 2 * tb * 4
                      + tb * tkn * 4                     # one-hot chunk
                      + tb * d * 4)                      # acc scratch
        vmem_limit = min(max(int(vmem_bytes * 1.5) + (4 << 20), 16 << 20), 48 << 20)

        dims = (("parallel" if num_blocks >= 8 else "arbitrary"), "arbitrary")

        out = pl.pallas_call(
            kernel,
            out_shape=jax.ShapeDtypeStruct((b, d), tdtype),
            grid_spec=pltpu.PrefetchScalarGridSpec(
                num_scalar_prefetch=0,
                grid=(num_blocks, n_pad // tkn),
                in_specs=[
                    pl.BlockSpec((tb, 1), lambda i, k: (i, 0)),
                    pl.BlockSpec((tkn, d), lambda i, k: (k, 0)),
                ],
                out_specs=pl.BlockSpec((tb, d), lambda i, k: (i, 0)),
                scratch_shapes=[pltpu.VMEM((tb, d), jnp.float32)],
            ),
            compiler_params=pltpu.CompilerParams(
                dimension_semantics=dims,
                vmem_limit_bytes=vmem_limit),
            cost_estimate=cost,
        )(idx_padded, tbl)

    return out.reshape(indices.shape + (d,))


if __name__ == "__main__":
    number_group = 16
    embedding_dim = 128   # lane-aligned embedding width

    key = jax.random.PRNGKey(0)
    k_table, k_idx, k_idx_big, k_tbl2, k_idx2 = jax.random.split(key, 5)

    # nn.Embedding-style weight table.
    table = jax.random.normal(k_table, (number_group, embedding_dim),
                              dtype=jnp.float32)

    # num_group: integer group-id tensor, e.g. a (batch, seq) of group indices.
    num_group = jax.random.randint(k_idx, (2, 8), 0, number_group,
                                   dtype=jnp.int32)

    group_embeds = jax.block_until_ready(group_embedding_lookup(table, num_group))
    ref = jnp.take(table, num_group.reshape(-1), axis=0).reshape(
        num_group.shape + (embedding_dim,))
    assert group_embeds.shape == (2, 8, embedding_dim)
    assert jnp.allclose(group_embeds, ref)

    # Larger lookup: exercises the multi-tile (grid > 1) path with a ragged
    # last output block (no host-side slice).
    big_idx = jax.random.randint(k_idx_big, (1300,), 0, number_group,
                                 dtype=jnp.int32)
    big_out = jax.block_until_ready(group_embedding_lookup(table, big_idx))
    big_ref = jnp.take(table, big_idx, axis=0)
    assert big_out.shape == (1300, embedding_dim)
    assert jnp.allclose(big_out, big_ref)

    # bf16 table large enough to take the one-hot MXU path (exact gather).
    n_groups2 = 256
    table_bf16 = jax.random.normal(
        k_tbl2, (n_groups2, embedding_dim), dtype=jnp.float32).astype(jnp.bfloat16)
    idx_bf16 = jax.random.randint(k_idx2, (300,), 0, n_groups2, dtype=jnp.int32)
    out_bf16 = jax.block_until_ready(group_embedding_lookup(table_bf16, idx_bf16))
    ref_bf16 = jnp.take(table_bf16, idx_bf16, axis=0)
    assert out_bf16.shape == (300, embedding_dim)
    assert jnp.array_equal(out_bf16, ref_bf16)

    print("KERNEL_OK")
</pallas_src>

<mosaic_0001>
module attributes {stable_mosaic.version = 11 : i64} {
  func.func @kernel(%arg0: i32, %arg1: memref<16x1xi32, #tpu.memory_space<vmem>>, %arg2: memref<16x128xf32, #tpu.memory_space<vmem>>, %arg3: memref<16x128xf32, #tpu.memory_space<vmem>>) attributes {dimension_semantics = [#tpu.dimension_semantics<arbitrary>], iteration_bounds = array<i64: 1>, scalar_prefetch = 0 : i64, scratch_operands = 0 : i64, tpu.core_type = #tpu.core_type<tc>, window_params = [{transform_indices = @transform_0, window_bounds = array<i64: 16, 1>}, {pipeline_mode = #tpu.pipeline_mode<synchronous>, transform_indices = @transform_1, window_bounds = array<i64: 16, 128>}, {transform_indices = @transform_2, window_bounds = array<i64: 16, 128>}]} {
    %c0 = arith.constant 0 : index
    %c0_0 = arith.constant 0 : index
    %0 = vector.load %arg1[%c0, %c0_0] : memref<16x1xi32, #tpu.memory_space<vmem>>, vector<16x1xi32>
    %c0_i32 = arith.constant 0 : i32
    %c15_i32 = arith.constant 15 : i32
    %1 = vector.broadcast %c0_i32 : i32 to vector<16x1xi32>
    %2 = arith.maxsi %1, %0 : vector<16x1xi32>
    %3 = vector.broadcast %c15_i32 : i32 to vector<16x1xi32>
    %4 = arith.minsi %3, %2 : vector<16x1xi32>
    %c0_1 = arith.constant 0 : index
    %c0_2 = arith.constant 0 : index
    %5 = vector.load %arg2[%c0_1, %c0_2] : memref<16x128xf32, #tpu.memory_space<vmem>>, vector<16x128xf32>
    %6 = vector.extract_strided_slice %5 {offsets = [0, 0], sizes = [1, 128], strides = [1, 1]} : vector<16x128xf32> to vector<1x128xf32>
    %7 = vector.shape_cast %6 : vector<1x128xf32> to vector<1x128xf32>
    %8 = vector.broadcast %7 : vector<1x128xf32> to vector<16x128xf32>
    %c1_i32 = arith.constant 1 : i32
    %9 = vector.broadcast %c1_i32 : i32 to vector<16x1xi32>
    %10 = arith.cmpi eq, %4, %9 : vector<16x1xi32>
    %11 = vector.extract_strided_slice %5 {offsets = [1, 0], sizes = [1, 128], strides = [1, 1]} : vector<16x128xf32> to vector<1x128xf32>
    %12 = vector.shape_cast %10 : vector<16x1xi1> to vector<16x1xi1>
    %13 = vector.broadcast %12 : vector<16x1xi1> to vector<16x128xi1>
    %14 = vector.shape_cast %11 : vector<1x128xf32> to vector<1x128xf32>
    %15 = vector.broadcast %14 : vector<1x128xf32> to vector<16x128xf32>
    %16 = arith.select %13, %15, %8 : vector<16x128xi1>, vector<16x128xf32>
    %c2_i32 = arith.constant 2 : i32
    %17 = vector.broadcast %c2_i32 : i32 to vector<16x1xi32>
    %18 = arith.cmpi eq, %4, %17 : vector<16x1xi32>
    %19 = vector.extract_strided_slice %5 {offsets = [2, 0], sizes = [1, 128], strides = [1, 1]} : vector<16x128xf32> to vector<1x128xf32>
    %20 = vector.shape_cast %18 : vector<16x1xi1> to vector<16x1xi1>
    %21 = vector.broadcast %20 : vector<16x1xi1> to vector<16x128xi1>
    %22 = vector.shape_cast %19 : vector<1x128xf32> to vector<1x128xf32>
    %23 = vector.broadcast %22 : vector<1x128xf32> to vector<16x128xf32>
    %24 = arith.select %21, %23, %16 : vector<16x128xi1>, vector<16x128xf32>
    %c3_i32 = arith.constant 3 : i32
    %25 = vector.broadcast %c3_i32 : i32 to vector<16x1xi32>
    %26 = arith.cmpi eq, %4, %25 : vector<16x1xi32>
    %27 = vector.extract_strided_slice %5 {offsets = [3, 0], sizes = [1, 128], strides = [1, 1]} : vector<16x128xf32> to vector<1x128xf32>
    %28 = vector.shape_cast %26 : vector<16x1xi1> to vector<16x1xi1>
    %29 = vector.broadcast %28 : vector<16x1xi1> to vector<16x128xi1>
    %30 = vector.shape_cast %27 : vector<1x128xf32> to vector<1x128xf32>
    %31 = vector.broadcast %30 : vector<1x128xf32> to vector<16x128xf32>
    %32 = arith.select %29, %31, %24 : vector<16x128xi1>, vector<16x128xf32>
    %c4_i32 = arith.constant 4 : i32
    %33 = vector.broadcast %c4_i32 : i32 to vector<16x1xi32>
    %34 = arith.cmpi eq, %4, %33 : vector<16x1xi32>
    %35 = vector.extract_strided_slice %5 {offsets = [4, 0], sizes = [1, 128], strides = [1, 1]} : vector<16x128xf32> to vector<1x128xf32>
    %36 = vector.shape_cast %34 : vector<16x1xi1> to vector<16x1xi1>
    %37 = vector.broadcast %36 : vector<16x1xi1> to vector<16x128xi1>
    %38 = vector.shape_cast %35 : vector<1x128xf32> to vector<1x128xf32>
    %39 = vector.broadcast %38 : vector<1x128xf32> to vector<16x128xf32>
    %40 = arith.select %37, %39, %32 : vector<16x128xi1>, vector<16x128xf32>
    %c5_i32 = arith.constant 5 : i32
    %41 = vector.broadcast %c5_i32 : i32 to vector<16x1xi32>
    %42 = arith.cmpi eq, %4, %41 : vector<16x1xi32>
    %43 = vector.extract_strided_slice %5 {offsets = [5, 0], sizes = [1, 128], strides = [1, 1]} : vector<16x128xf32> to vector<1x128xf32>
    %44 = vector.shape_cast %42 : vector<16x1xi1> to vector<16x1xi1>
    %45 = vector.broadcast %44 : vector<16x1xi1> to vector<16x128xi1>
    %46 = vector.shape_cast %43 : vector<1x128xf32> to vector<1x128xf32>
    %47 = vector.broadcast %46 : vector<1x128xf32> to vector<16x128xf32>
    %48 = arith.select %45, %47, %40 : vector<16x128xi1>, vector<16x128xf32>
    %c6_i32 = arith.constant 6 : i32
    %49 = vector.broadcast %c6_i32 : i32 to vector<16x1xi32>
    %50 = arith.cmpi eq, %4, %49 : vector<16x1xi32>
    %51 = vector.extract_strided_slice %5 {offsets = [6, 0], sizes = [1, 128], strides = [1, 1]} : vector<16x128xf32> to vector<1x128xf32>
    %52 = vector.shape_cast %50 : vector<16x1xi1> to vector<16x1xi1>
    %53 = vector.broadcast %52 : vector<16x1xi1> to vector<16x128xi1>
    %54 = vector.shape_cast %51 : vector<1x128xf32> to vector<1x128xf32>
    %55 = vector.broadcast %54 : vector<1x128xf32> to vector<16x128xf32>
    %56 = arith.select %53, %55, %48 : vector<16x128xi1>, vector<16x128xf32>
    %c7_i32 = arith.constant 7 : i32
    %57 = vector.broadcast %c7_i32 : i32 to vector<16x1xi32>
    %58 = arith.cmpi eq, %4, %57 : vector<16x1xi32>
    %59 = vector.extract_strided_slice %5 {offsets = [7, 0], sizes = [1, 128], strides = [1, 1]} : vector<16x128xf32> to vector<1x128xf32>
    %60 = vector.shape_cast %58 : vector<16x1xi1> to vector<16x1xi1>
    %61 = vector.broadcast %60 : vector<16x1xi1> to vector<16x128xi1>
    %62 = vector.shape_cast %59 : vector<1x128xf32> to vector<1x128xf32>
    %63 = vector.broadcast %62 : vector<1x128xf32> to vector<16x128xf32>
    %64 = arith.select %61, %63, %56 : vector<16x128xi1>, vector<16x128xf32>
    %c8_i32 = arith.constant 8 : i32
    %65 = vector.broadcast %c8_i32 : i32 to vector<16x1xi32>
    %66 = arith.cmpi eq, %4, %65 : vector<16x1xi32>
    %67 = vector.extract_strided_slice %5 {offsets = [8, 0], sizes = [1, 128], strides = [1, 1]} : vector<16x128xf32> to vector<1x128xf32>
    %68 = vector.shape_cast %66 : vector<16x1xi1> to vector<16x1xi1>
    %69 = vector.broadcast %68 : vector<16x1xi1> to vector<16x128xi1>
    %70 = vector.shape_cast %67 : vector<1x128xf32> to vector<1x128xf32>
    %71 = vector.broadcast %70 : vector<1x128xf32> to vector<16x128xf32>
    %72 = arith.select %69, %71, %64 : vector<16x128xi1>, vector<16x128xf32>
    %c9_i32 = arith.constant 9 : i32
    %73 = vector.broadcast %c9_i32 : i32 to vector<16x1xi32>
    %74 = arith.cmpi eq, %4, %73 : vector<16x1xi32>
    %75 = vector.extract_strided_slice %5 {offsets = [9, 0], sizes = [1, 128], strides = [1, 1]} : vector<16x128xf32> to vector<1x128xf32>
    %76 = vector.shape_cast %74 : vector<16x1xi1> to vector<16x1xi1>
    %77 = vector.broadcast %76 : vector<16x1xi1> to vector<16x128xi1>
    %78 = vector.shape_cast %75 : vector<1x128xf32> to vector<1x128xf32>
    %79 = vector.broadcast %78 : vector<1x128xf32> to vector<16x128xf32>
    %80 = arith.select %77, %79, %72 : vector<16x128xi1>, vector<16x128xf32>
    %c10_i32 = arith.constant 10 : i32
    %81 = vector.broadcast %c10_i32 : i32 to vector<16x1xi32>
    %82 = arith.cmpi eq, %4, %81 : vector<16x1xi32>
    %83 = vector.extract_strided_slice %5 {offsets = [10, 0], sizes = [1, 128], strides = [1, 1]} : vector<16x128xf32> to vector<1x128xf32>
    %84 = vector.shape_cast %82 : vector<16x1xi1> to vector<16x1xi1>
    %85 = vector.broadcast %84 : vector<16x1xi1> to vector<16x128xi1>
    %86 = vector.shape_cast %83 : vector<1x128xf32> to vector<1x128xf32>
    %87 = vector.broadcast %86 : vector<1x128xf32> to vector<16x128xf32>
    %88 = arith.select %85, %87, %80 : vector<16x128xi1>, vector<16x128xf32>
    %c11_i32 = arith.constant 11 : i32
    %89 = vector.broadcast %c11_i32 : i32 to vector<16x1xi32>
    %90 = arith.cmpi eq, %4, %89 : vector<16x1xi32>
    %91 = vector.extract_strided_slice %5 {offsets = [11, 0], sizes = [1, 128], strides = [1, 1]} : vector<16x128xf32> to vector<1x128xf32>
    %92 = vector.shape_cast %90 : vector<16x1xi1> to vector<16x1xi1>
    %93 = vector.broadcast %92 : vector<16x1xi1> to vector<16x128xi1>
    %94 = vector.shape_cast %91 : vector<1x128xf32> to vector<1x128xf32>
    %95 = vector.broadcast %94 : vector<1x128xf32> to vector<16x128xf32>
    %96 = arith.select %93, %95, %88 : vector<16x128xi1>, vector<16x128xf32>
    %c12_i32 = arith.constant 12 : i32
    %97 = vector.broadcast %c12_i32 : i32 to vector<16x1xi32>
    %98 = arith.cmpi eq, %4, %97 : vector<16x1xi32>
    %99 = vector.extract_strided_slice %5 {offsets = [12, 0], sizes = [1, 128], strides = [1, 1]} : vector<16x128xf32> to vector<1x128xf32>
    %100 = vector.shape_cast %98 : vector<16x1xi1> to vector<16x1xi1>
    %101 = vector.broadcast %100 : vector<16x1xi1> to vector<16x128xi1>
    %102 = vector.shape_cast %99 : vector<1x128xf32> to vector<1x128xf32>
    %103 = vector.broadcast %102 : vector<1x128xf32> to vector<16x128xf32>
    %104 = arith.select %101, %103, %96 : vector<16x128xi1>, vector<16x128xf32>
    %c13_i32 = arith.constant 13 : i32
    %105 = vector.broadcast %c13_i32 : i32 to vector<16x1xi32>
    %106 = arith.cmpi eq, %4, %105 : vector<16x1xi32>
    %107 = vector.extract_strided_slice %5 {offsets = [13, 0], sizes = [1, 128], strides = [1, 1]} : vector<16x128xf32> to vector<1x128xf32>
    %108 = vector.shape_cast %106 : vector<16x1xi1> to vector<16x1xi1>
    %109 = vector.broadcast %108 : vector<16x1xi1> to vector<16x128xi1>
    %110 = vector.shape_cast %107 : vector<1x128xf32> to vector<1x128xf32>
    %111 = vector.broadcast %110 : vector<1x128xf32> to vector<16x128xf32>
    %112 = arith.select %109, %111, %104 : vector<16x128xi1>, vector<16x128xf32>
    %c14_i32 = arith.constant 14 : i32
    %113 = vector.broadcast %c14_i32 : i32 to vector<16x1xi32>
    %114 = arith.cmpi eq, %4, %113 : vector<16x1xi32>
    %115 = vector.extract_strided_slice %5 {offsets = [14, 0], sizes = [1, 128], strides = [1, 1]} : vector<16x128xf32> to vector<1x128xf32>
    %116 = vector.shape_cast %114 : vector<16x1xi1> to vector<16x1xi1>
    %117 = vector.broadcast %116 : vector<16x1xi1> to vector<16x128xi1>
    %118 = vector.shape_cast %115 : vector<1x128xf32> to vector<1x128xf32>
    %119 = vector.broadcast %118 : vector<1x128xf32> to vector<16x128xf32>
    %120 = arith.select %117, %119, %112 : vector<16x128xi1>, vector<16x128xf32>
    %c15_i32_3 = arith.constant 15 : i32
    %121 = vector.broadcast %c15_i32_3 : i32 to vector<16x1xi32>
    %122 = arith.cmpi eq, %4, %121 : vector<16x1xi32>
    %123 = vector.extract_strided_slice %5 {offsets = [15, 0], sizes = [1, 128], strides = [1, 1]} : vector<16x128xf32> to vector<1x128xf32>
    %124 = vector.shape_cast %122 : vector<16x1xi1> to vector<16x1xi1>
    %125 = vector.broadcast %124 : vector<16x1xi1> to vector<16x128xi1>
    %126 = vector.shape_cast %123 : vector<1x128xf32> to vector<1x128xf32>
    %127 = vector.broadcast %126 : vector<1x128xf32> to vector<16x128xf32>
    %128 = arith.select %125, %127, %120 : vector<16x128xi1>, vector<16x128xf32>
    %c0_4 = arith.constant 0 : index
    %c0_5 = arith.constant 0 : index
    %129 = vector.load %arg3[%c0_4, %c0_5] : memref<16x128xf32, #tpu.memory_space<vmem>>, vector<16x128xf32>
    tpu.vector_store %arg3[%c0_4, %c0_5], %128 {strides = array<i32>} : memref<16x128xf32, #tpu.memory_space<vmem>>, vector<16x128xf32>,
    return
  }
  func.func @transform_0(%arg0: i32) -> (i32, i32) {
    %c0_i32 = arith.constant 0 : i32
    %c0_i32_0 = arith.constant 0 : i32
    return %arg0, %c0_i32 : i32, i32
  }
  func.func @transform_1(%arg0: i32) -> (i32, i32) {
    %c0_i32 = arith.constant 0 : i32
    %c0_i32_0 = arith.constant 0 : i32
    %c0_i32_1 = arith.constant 0 : i32
    return %c0_i32, %c0_i32_0 : i32, i32
  }
  func.func @transform_2(%arg0: i32) -> (i32, i32) {
    %c0_i32 = arith.constant 0 : i32
    %c0_i32_0 = arith.constant 0 : i32
    return %arg0, %c0_i32 : i32, i32
  }
}

</mosaic_0001>

<bundles_post_ra>
// kernel: tpu_custom_call.1
= control target key start
LH: loop header
LB: loop body
LE: loop exit
PB: predicated region body
PF: predicated region fallthrough
CT: control target
= control target key end

     0   :  { %s513_s0 = inlined_call_operand.vmem [shape: s32[16,1], index: 0, kind: input, shape index: {}]   ;;  %s514_s1 = inlined_call_operand.vmem [shape: f32[16,128], index: 1, kind: input, shape index: {}]   ;;  %s515_s2 = inlined_call_operand.hbm [shape: f32[16,128], index: 2, kind: output, shape index: {}]  }
   0x1   :  { %v12_v0 = vld [vmem:[%s513_s0] sm:$0xff]  ;;  %v13_v1 = vld [vmem:[%s513_s0 + $0x8] sm:$0xff] }
   0x2   :  { %7 = vsyncpa [#allocation3], 0  ;;  %v346_v2 = vmov 0   ;;  %vm14_vm0 = vcmp.gt.s32.totalorder %v12_v0, 0  ;;  %vm16_vm1 = vcmp.gt.s32.totalorder %v13_v1, 0  ;;  %v24_v51 = vlaneseq  ;;  %v22_v59 = vld [vmem:[%s514_s1] sm:$0xff] }
   0x3   :  { %321 = vset.pattern.permute.xlu1 %v346_v2  ;;  %320 = vset.pattern.permute.xlu0 %v346_v2  ;;  %v15_v3 = vsel %vm14_vm0, %v12_v0, 0  ;;  %v17_v4 = vsel %vm16_vm1, %v13_v1, 0 }
   0x4   :  { %vm18_vm2 = vcmp.lt.s32.totalorder %v15_v3, 15  ;;  %vm20_vm3 = vcmp.lt.s32.totalorder %v17_v4, 15  ;;  %v25_v54 = vshrl.u32 %v24_v51, 7 }
   0x5   :  { %v373_v5 = vsel %vm18_vm2, %v15_v3, 15  ;;  %v375_v6 = vsel %vm20_vm3, %v17_v4, 15 }
   0x6   :  { %vm46_vm4 = vcmp.eq.s32.totalorder %v373_v5, 2  ;;  %vm28_vm5 = vcmp.eq.s32.totalorder %v373_v5, 1  ;;  %vm47_vm6 = vcmp.eq.s32.totalorder %v375_v6, 2  ;;  %vm29_vm7 = vcmp.eq.s32.totalorder %v375_v6, 1 }
   0x7   :  { %v48_v7 = vsel %vm46_vm4, 1, %v346_v2  ;;  %v30_v8 = vsel %vm28_vm5, 1, %v346_v2  ;;  %v49_v9 = vsel %vm47_vm6, 1, %v346_v2  ;;  %v31_v10 = vsel %vm29_vm7, 1, %v346_v2 }
   0x8   :  { %51 = vperm.xlu1 %321, %v48_v7   ;;  %33 = vperm.xlu0 %320, %v30_v8   ;;  %vm65_vm8 = vcmp.eq.s32.totalorder %v375_v6, 3  ;;  %vm64_vm9 = vcmp.eq.s32.totalorder %v373_v5, 3  ;;  %vm83_vm10 = vcmp.eq.s32.totalorder %v375_v6, 4  ;;  %vm82_vm11 = vcmp.eq.s32.totalorder %v373_v5, 4 }
   0x9   :  { %v67_v11 = vsel %vm65_vm8, 1, %v346_v2  ;;  %v66_v12 = vsel %vm64_vm9, 1, %v346_v2  ;;  %v85_v13 = vsel %vm83_vm10, 1, %v346_v2  ;;  %v84_v14 = vsel %vm82_vm11, 1, %v346_v2 }
   0xa   :  { %vm101_vm12 = vcmp.eq.s32.totalorder %v375_v6, 5  ;;  %vm100_vm13 = vcmp.eq.s32.totalorder %v373_v5, 5  ;;  %vm119_vm14 = vcmp.eq.s32.totalorder %v375_v6, 6  ;;  %vm118_vm15 = vcmp.eq.s32.totalorder %v373_v5, 6 }
   0xb   :  { %v103_v15 = vsel %vm101_vm12, 1, %v346_v2  ;;  %v102_v16 = vsel %vm100_vm13, 1, %v346_v2  ;;  %v121_v17 = vsel %vm119_vm14, 1, %v346_v2  ;;  %v120_v18 = vsel %vm118_vm15, 1, %v346_v2 }
   0xc   :  { %54 = vperm.xlu1 %321, %v49_v9   ;;  %36 = vperm.xlu0 %320, %v31_v10   ;;  %vm137_vm0 = vcmp.eq.s32.totalorder %v375_v6, 7  ;;  %vm136_vm1 = vcmp.eq.s32.totalorder %v373_v5, 7  ;;  %vm155_vm2 = vcmp.eq.s32.totalorder %v375_v6, 8  ;;  %vm154_vm3 = vcmp.eq.s32.totalorder %v373_v5, 8 }
   0xd   :  { %v139_v19 = vsel %vm137_vm0, 1, %v346_v2  ;;  %v138_v20 = vsel %vm136_vm1, 1, %v346_v2  ;;  %v157_v21 = vsel %vm155_vm2, 1, %v346_v2  ;;  %v156_v22 = vsel %vm154_vm3, 1, %v346_v2 }
   0xe   :  { %vm173_vm4 = vcmp.eq.s32.totalorder %v375_v6, 9  ;;  %vm172_vm5 = vcmp.eq.s32.totalorder %v373_v5, 9  ;;  %vm191_vm6 = vcmp.eq.s32.totalorder %v375_v6, 10  ;;  %vm190_vm7 = vcmp.eq.s32.totalorder %v373_v5, 10 }
   0xf   :  { %v175_v23 = vsel %vm173_vm4, 1, %v346_v2  ;;  %v174_v24 = vsel %vm172_vm5, 1, %v346_v2  ;;  %v193_v25 = vsel %vm191_vm6, 1, %v346_v2  ;;  %v192_v26 = vsel %vm190_vm7, 1, %v346_v2 }
  0x10   :  { %72 = vperm.xlu1 %321, %v67_v11   ;;  %69 = vperm.xlu0 %320, %v66_v12   ;;  %vm209_vm8 = vcmp.eq.s32.totalorder %v375_v6, 11  ;;  %vm208_vm9 = vcmp.eq.s32.totalorder %v373_v5, 11  ;;  %vm227_vm10 = vcmp.eq.s32.totalorder %v375_v6, 12  ;;  %vm226_vm11 = vcmp.eq.s32.totalorder %v373_v5, 12 }
  0x11   :  { %v211_v27 = vsel %vm209_vm8, 1, %v346_v2  ;;  %v210_v28 = vsel %vm208_vm9, 1, %v346_v2  ;;  %v229_v29 = vsel %vm227_vm10, 1, %v346_v2  ;;  %v228_v30 = vsel %vm226_vm11, 1, %v346_v2 }
  0x12   :  { %vm245_vm12 = vcmp.eq.s32.totalorder %v375_v6, 13  ;;  %vm244_vm13 = vcmp.eq.s32.totalorder %v373_v5, 13  ;;  %vm263_vm14 = vcmp.eq.s32.totalorder %v375_v6, 14  ;;  %vm262_vm15 = vcmp.eq.s32.totalorder %v373_v5, 14 }
  0x13   :  { %v247_v31 = vsel %vm245_vm12, 1, %v346_v2  ;;  %v246_v32 = vsel %vm244_vm13, 1, %v346_v2  ;;  %v265_v33 = vsel %vm263_vm14, 1, %v346_v2  ;;  %v264_v34 = vsel %vm262_vm15, 1, %v346_v2 }
  0x14   :  { %90 = vperm.xlu1 %321, %v85_v13   ;;  %87 = vperm.xlu0 %320, %v84_v14   ;;  %vm281_vm0 = vcmp.eq.s32.totalorder %v375_v6, 15  ;;  %vm280_vm1 = vcmp.eq.s32.totalorder %v373_v5, 15  ;;  %v26_v57 = vsub.s32 0, %v25_v54  ;;  %v42_v58 = vsub.s32 1, %v25_v54  ;;  %v23_v6 = vld [vmem:[%s514_s1 + $0x8] sm:$0xff]  ;;  %s347_s1 = smov [#allocation2]  }
  0x15   :  { %v283_v35 = vsel %vm281_vm0, 1, %v346_v2  ;;  %v282_v36 = vsel %vm280_vm1, 1, %v346_v2  ;;  %v60_v60 = vsub.s32 2, %v25_v54  ;;  %v78_v61 = vsub.s32 3, %v25_v54  ;;  %s305_s16 = sshll.u32 %s347_s1, 4  ;;  %s306_s16 = int_to_ptr.vmem [resolvable:$true] %s305_s16 }
  0x16   :  { %v96_v62 = vsub.s32 4, %v25_v54  ;;  %v114_v63 = vsub.s32 5, %v25_v54  ;;  %v132_v0 = vsub.s32 6, %v25_v54  ;;  %v150_v1 = vsub.s32 7, %v25_v54  ;;  %s322_s17 = scalar_lea.vmem %s306_s16, 256  ;;  %p327_p1 = scmp.lt.s32.totalorder %s306_s16, %s306_s16 }
  0x17   :  { %v27_v4 = vrot.slane %v22_v59, %v26_v57  ;;  %v43_v5 = vrot.slane %v22_v59, %v42_v58  ;;  %v61_v7 = vrot.slane %v22_v59, %v60_v60  ;;  %v79_v8 = vrot.slane %v22_v59, %v78_v61  ;;  %p323_p0 = scmp.ne.s32.totalorder %s306_s16, %s322_s17  ;;  %p328_p2 = scmp.lt.s32.totalorder %s322_s17, %s322_s17 }
  0x18   :  { %108 = vperm.xlu1 %321, %v103_v15   ;;  %105 = vperm.xlu0 %320, %v102_v16   ;;  %v97_v9 = vrot.slane %v22_v59, %v96_v62  ;;  %v115_v10 = vrot.slane %v22_v59, %v114_v63  ;;  %v133_v11 = vrot.slane %v22_v59, %v132_v0 }
  0x19   :  { %v151_v12 = vrot.slane %v22_v59, %v150_v1  ;;  %v169_v15 = vrot.slane %v23_v6, %v26_v57  ;;  %v187_v16 = vrot.slane %v23_v6, %v42_v58  ;;  %p329_p3 = por %p328_p2, %p327_p1 }
  0x1b   :  { %p330_p4 = pnand %p329_p3, %p323_p0 }
  0x1c   :  { %126 = vperm.xlu1 %321, %v121_v17   ;;  %123 = vperm.xlu0 %320, %v120_v18   ;;  %v205_v17 = vrot.slane %v23_v6, %v60_v60  ;;  %v223_v18 = vrot.slane %v23_v6, %v78_v61 }
  0x20   :  { %144 = vperm.xlu1 %321, %v139_v19   ;;  %141 = vperm.xlu0 %320, %v138_v20  }
  0x24   :  { %162 = vperm.xlu1 %321, %v157_v21   ;;  %159 = vperm.xlu0 %320, %v156_v22   ;;  %v241_v21 = vrot.slane %v23_v6, %v96_v62  ;;  %v259_v22 = vrot.slane %v23_v6, %v114_v63 }
  0x28   :  { %180 = vperm.xlu1 %321, %v175_v23   ;;  %177 = vperm.xlu0 %320, %v174_v24  }
  0x2c   :  { %198 = vperm.xlu1 %321, %v193_v25   ;;  %195 = vperm.xlu0 %320, %v192_v26   ;;  %v277_v25 = vrot.slane %v23_v6, %v132_v0  ;;  %v295_v26 = vrot.slane %v23_v6, %v150_v1 }
  0x30   :  { %216 = vperm.xlu1 %321, %v211_v27   ;;  %213 = vperm.xlu0 %320, %v210_v28  }
  0x34   :  { %234 = vperm.xlu1 %321, %v229_v29   ;;  %231 = vperm.xlu0 %320, %v228_v30  }
  0x38   :  { %252 = vperm.xlu1 %321, %v247_v31   ;;  %249 = vperm.xlu0 %320, %v246_v32  }
  0x3c   :  { %270 = vperm.xlu1 %321, %v265_v33   ;;  %267 = vperm.xlu0 %320, %v264_v34  }
  0x40   :  { %288 = vperm.xlu1 %321, %v283_v35   ;;  %285 = vperm.xlu0 %320, %v282_v36  }
  0x87   :  { %v437_v37 = vpop.permute.xlu1 %51  ;;  %v34_v38 = vpop.permute.xlu0 %33 }
  0x88   :  { %vm38_vm2 = vcmp.eq.s32.totalorder %v34_v38, 1  ;;  %vm56_vm4 = vcmp.eq.s32.totalorder %v437_v37, 1 }
  0x89   :  { %v44_v19 = vsel %vm38_vm2, %v43_v5, %v27_v4 }
  0x8a   :  { %v62_v28 = vsel %vm56_vm4, %v61_v7, %v44_v19 }
  0x8b   :  { %v55_v39 = vpop.permute.xlu1 %54  ;;  %v37_v40 = vpop.permute.xlu0 %36 }
  0x8c   :  { %vm39_vm3 = vcmp.eq.s32.totalorder %v37_v40, 1  ;;  %vm57_vm5 = vcmp.eq.s32.totalorder %v55_v39, 1 }
  0x8d   :  { %v45_v20 = vsel %vm39_vm3, %v43_v5, %v27_v4 }
  0x8e   :  { %v63_v27 = vsel %vm57_vm5, %v61_v7, %v45_v20 }
  0x8f   :  { %v439_v41 = vpop.permute.xlu1 %72  ;;  %v441_v42 = vpop.permute.xlu0 %69 }
  0x90   :  { %vm75_vm6 = vcmp.eq.s32.totalorder %v439_v41, 1  ;;  %vm74_vm7 = vcmp.eq.s32.totalorder %v441_v42, 1 }
  0x91   :  { %v81_v29 = vsel %vm75_vm6, %v79_v8, %v63_v27  ;;  %v80_v30 = vsel %vm74_vm7, %v79_v8, %v62_v28 }
  0x93   :  { %v443_v43 = vpop.permute.xlu1 %90  ;;  %v445_v44 = vpop.permute.xlu0 %87 }
  0x94   :  { %vm93_vm8 = vcmp.eq.s32.totalorder %v443_v43, 1  ;;  %vm92_vm9 = vcmp.eq.s32.totalorder %v445_v44, 1 }
  0x95   :  { %v99_v31 = vsel %vm93_vm8, %v97_v9, %v81_v29  ;;  %v98_v32 = vsel %vm92_vm9, %v97_v9, %v80_v30 }
  0x97   :  { %v447_v45 = vpop.permute.xlu1 %108  ;;  %v449_v46 = vpop.permute.xlu0 %105 }
  0x98   :  { %vm111_vm10 = vcmp.eq.s32.totalorder %v447_v45, 1  ;;  %vm110_vm11 = vcmp.eq.s32.totalorder %v449_v46, 1 }
  0x99   :  { %v117_v33 = vsel %vm111_vm10, %v115_v10, %v99_v31  ;;  %v116_v34 = vsel %vm110_vm11, %v115_v10, %v98_v32 }
  0x9b   :  { %v451_v47 = vpop.permute.xlu1 %126  ;;  %v453_v48 = vpop.permute.xlu0 %123 }
  0x9c   :  { %vm129_vm12 = vcmp.eq.s32.totalorder %v451_v47, 1  ;;  %vm128_vm13 = vcmp.eq.s32.totalorder %v453_v48, 1 }
  0x9d   :  { %v135_v37 = vsel %vm129_vm12, %v133_v11, %v117_v33  ;;  %v134_v38 = vsel %vm128_vm13, %v133_v11, %v116_v34 }
  0x9f   :  { %v455_v49 = vpop.permute.xlu1 %144  ;;  %v457_v50 = vpop.permute.xlu0 %141 }
  0xa0   :  { %vm147_vm14 = vcmp.eq.s32.totalorder %v455_v49, 1  ;;  %vm146_vm15 = vcmp.eq.s32.totalorder %v457_v50, 1 }
  0xa1   :  { %v153_v39 = vsel %vm147_vm14, %v151_v12, %v135_v37  ;;  %v152_v40 = vsel %vm146_vm15, %v151_v12, %v134_v38 }
  0xa3   :  { %v459_v52 = vpop.permute.xlu1 %162  ;;  %v461_v53 = vpop.permute.xlu0 %159 }
  0xa4   :  { %vm165_vm0 = vcmp.eq.s32.totalorder %v459_v52, 1  ;;  %vm164_vm1 = vcmp.eq.s32.totalorder %v461_v53, 1 }
  0xa5   :  { %v171_v41 = vsel %vm165_vm0, %v169_v15, %v153_v39  ;;  %v170_v42 = vsel %vm164_vm1, %v169_v15, %v152_v40 }
  0xa7   :  { %v463_v55 = vpop.permute.xlu1 %180  ;;  %v465_v56 = vpop.permute.xlu0 %177 }
  0xa8   :  { %vm183_vm2 = vcmp.eq.s32.totalorder %v463_v55, 1  ;;  %vm182_vm3 = vcmp.eq.s32.totalorder %v465_v56, 1 }
  0xa9   :  { %v189_v43 = vsel %vm183_vm2, %v187_v16, %v171_v41  ;;  %v188_v44 = vsel %vm182_vm3, %v187_v16, %v170_v42 }
  0xab   :  { %v470_v2 = vpop.permute.xlu1 %198  ;;  %v472_v3 = vpop.permute.xlu0 %195 }
  0xac   :  { %vm201_vm4 = vcmp.eq.s32.totalorder %v470_v2, 1  ;;  %vm200_vm5 = vcmp.eq.s32.totalorder %v472_v3, 1 }
  0xad   :  { %v207_v47 = vsel %vm201_vm4, %v205_v17, %v189_v43  ;;  %v206_v48 = vsel %vm200_vm5, %v205_v17, %v188_v44 }
  0xaf   :  { %v477_v13 = vpop.permute.xlu1 %216  ;;  %v479_v14 = vpop.permute.xlu0 %213 }
  0xb0   :  { %vm219_vm6 = vcmp.eq.s32.totalorder %v477_v13, 1  ;;  %vm218_vm7 = vcmp.eq.s32.totalorder %v479_v14, 1 }
  0xb1   :  { %v225_v49 = vsel %vm219_vm6, %v223_v18, %v207_v47  ;;  %v224_v50 = vsel %vm218_vm7, %v223_v18, %v206_v48 }
  0xb3   :  { %v235_v23 = vpop.permute.xlu1 %234  ;;  %v232_v24 = vpop.permute.xlu0 %231 }
  0xb4   :  { %vm237_vm8 = vcmp.eq.s32.totalorder %v235_v23, 1  ;;  %vm236_vm9 = vcmp.eq.s32.totalorder %v232_v24, 1 }
  0xb5   :  { %v243_v51 = vsel %vm237_vm8, %v241_v21, %v225_v49  ;;  %v242_v52 = vsel %vm236_vm9, %v241_v21, %v224_v50 }
  0xb7   :  { %v253_v35 = vpop.permute.xlu1 %252  ;;  %v250_v36 = vpop.permute.xlu0 %249 }
  0xb8   :  { %vm255_vm10 = vcmp.eq.s32.totalorder %v253_v35, 1  ;;  %vm254_vm11 = vcmp.eq.s32.totalorder %v250_v36, 1 }
  0xb9   :  { %v261_v53 = vsel %vm255_vm10, %v259_v22, %v243_v51  ;;  %v260_v54 = vsel %vm254_vm11, %v259_v22, %v242_v52 }
  0xbb   :  { %v271_v45 = vpop.permute.xlu1 %270  ;;  %v268_v46 = vpop.permute.xlu0 %267 }
  0xbc   :  { %vm273_vm12 = vcmp.eq.s32.totalorder %v271_v45, 1  ;;  %vm272_vm13 = vcmp.eq.s32.totalorder %v268_v46, 1 }
  0xbd   :  { %v279_v57 = vsel %vm273_vm12, %v277_v25, %v261_v53  ;;  %v278_v58 = vsel %vm272_vm13, %v277_v25, %v260_v54 }
  0xbf   :  { %v289_v55 = vpop.permute.xlu1 %288  ;;  %v286_v56 = vpop.permute.xlu0 %285 }
  0xc0   :  { %vm291_vm14 = vcmp.eq.s32.totalorder %v289_v55, 1  ;;  %vm290_vm15 = vcmp.eq.s32.totalorder %v286_v56, 1 }
  0xc1   :  { %v297_v59 = vsel %vm291_vm14, %v295_v26, %v279_v57  ;;  %v296_v60 = vsel %vm290_vm15, %v295_v26, %v278_v58 }
  0xc2   :  { %299 = vst [vmem:[#allocation2 + $0x8] sm:$0xff] %v297_v59  ;;  %298 = vst [vmem:[#allocation2] sm:$0xff] %v296_v60 }
  0xc3   :  { %333 = shalt.err (!%p330_p4)
}
  0xc4   :  { %s334_s20 = scalar_lea.hbm %s515_s2, 256 }
  0xc5   :  { %p335_p5 = scmp.ne.s32.totalorder %s515_s2, %s334_s20  ;;  %p338_p6 = scmp.lt.u32.totalorder %s334_s20, %s515_s2 }
  0xc7   :  { %p340_p7 = pnand %p338_p6, %p335_p5 }
  0xc9   :  { %343 = shalt.err (!%p340_p7)
}
  0xca   :  { %s348_s25 = smov 128   ;;  %s349_s26 = smov 8  }
  0xcb   :  { %311 = dma.vmem_to_hbm [thread:$0]  %s306_s16, 256, %s515_s2, [#allocation3], %s348_s25, %s348_s25, %s349_s26  }
  0xcc   :  { %344 = dma.done.wait [#allocation3], 256  }
  0xcd   :  { %345 = vsyncadd [#allocation3], 4294967040 }
  0xce   :  { %315 = vsyncpa [#allocation3], 1 }

</bundles_post_ra>
